<compile_context>
chip_gen: v6e
topology: v6e:2x2x1
jax: 0.10.0
libtpu: 0.0.40
codegen_flags: <defaults>
</compile_context>

<pallas_src>
import jax
import jax.numpy as jnp
from jax.experimental import pallas as pl
from jax.experimental.pallas import tpu as pltpu

_LANES = 128
_TARGET_TILE_BYTES = 2 * 1024 * 1024  # ~2 MiB per input tile per grid step


def _relu_kernel(x_ref, o_ref):
    # torch.relu semantics: max(x, 0)
    o_ref[...] = jnp.maximum(x_ref[...], jnp.zeros((), x_ref.dtype))


def _round_up(a: int, b: int) -> int:
    return ((a + b - 1) // b) * b


def relu_pallas(x: jax.Array) -> jax.Array:
    """Elementwise ReLU via a Pallas TPU kernel. Accepts any shape (e.g. NCHW)."""
    orig_shape = x.shape
    orig_dtype = x.dtype
    n = x.size
    if n == 0:
        return x

    itemsize = jnp.dtype(orig_dtype).itemsize
    # Native packed sublane count: 8 for 4-byte, 16 for 2-byte, 32 for 1-byte.
    sublanes = max(8, 32 // itemsize)

    x_flat = x.reshape(-1)

    # Fast path is copy-free: only pad (full-array concatenate) when the
    # element count is not a multiple of the 128-lane width.
    pad = (-n) % _LANES
    if pad:
        x_flat = jnp.concatenate([x_flat, jnp.zeros((pad,), dtype=orig_dtype)])
    rows = x_flat.size // _LANES
    x2d = x_flat.reshape(rows, _LANES)

    # MiB-scale row block; keep it a multiple of the packed sublane count so
    # bf16/int8 blocks never drop below their native (16/32, 128) tile.
    block_rows = max(sublanes, _TARGET_TILE_BYTES // (_LANES * itemsize))
    block_rows = min(block_rows, _round_up(rows, sublanes))
    block_rows = _round_up(block_rows, sublanes)

    # Ragged last block is handled by Pallas; no divisibility loop needed.
    grid = (pl.cdiv(rows, block_rows),)

    tile_bytes = block_rows * _LANES * itemsize
    # 2 buffers x (input + output) tiles, plus headroom. Safe within v5e's
    # 16 MiB default scoped VMEM and v7x's 64 MiB physical VMEM.
    vmem_budget = max(16 << 20, 4 * tile_bytes + (2 << 20))

    out2d = pl.pallas_call(
        _relu_kernel,
        out_shape=jax.ShapeDtypeStruct((rows, _LANES), orig_dtype),
        grid_spec=pltpu.PrefetchScalarGridSpec(
            num_scalar_prefetch=0,
            grid=grid,
            in_specs=[pl.BlockSpec((block_rows, _LANES), lambda i: (i, 0))],
            out_specs=pl.BlockSpec((block_rows, _LANES), lambda i: (i, 0)),
        ),
        compiler_params=pltpu.CompilerParams(
            dimension_semantics=("parallel",),
            vmem_limit_bytes=vmem_budget,
        ),
    )(x2d)

    out_flat = out2d.reshape(-1)
    if pad:
        out_flat = out_flat[:n]
    return out_flat.reshape(orig_shape)


if __name__ == "__main__":
    key = jax.random.PRNGKey(0)
    # Small NCHW input consistent with a typical conv-net activation.
    x = jax.random.normal(key, (2, 4, 16, 16), dtype=jnp.float32)

    y = relu_pallas(x)
    jax.block_until_ready(y)

    # Correctness check against the module's reference semantics: x * (x > 0)
    y_ref = x * (x > 0)
    assert y.shape == x.shape and y.dtype == x.dtype
    assert jnp.allclose(y, y_ref), "mismatch vs reference ReLU"

    print("KERNEL_OK")
</pallas_src>

<mosaic_0001>
module attributes {stable_mosaic.version = 11 : i64} {
  func.func @_relu_kernel(%arg0: i32, %arg1: memref<16x128xf32, #tpu.memory_space<vmem>>, %arg2: memref<16x128xf32, #tpu.memory_space<vmem>>) attributes {dimension_semantics = [#tpu.dimension_semantics<parallel>], iteration_bounds = array<i64: 1>, scalar_prefetch = 0 : i64, scratch_operands = 0 : i64, tpu.core_type = #tpu.core_type<tc>, window_params = [{transform_indices = @transform_0, window_bounds = array<i64: 16, 128>}, {transform_indices = @transform_1, window_bounds = array<i64: 16, 128>}]} {
    %c0 = arith.constant 0 : index
    %c0_0 = arith.constant 0 : index
    %0 = vector.load %arg1[%c0, %c0_0] : memref<16x128xf32, #tpu.memory_space<vmem>>, vector<16x128xf32>
    %cst = arith.constant 0.000000e+00 : f32
    %1 = vector.broadcast %cst : f32 to vector<16x128xf32>
    %2 = arith.maximumf %0, %1 : vector<16x128xf32>
    %c0_1 = arith.constant 0 : index
    %c0_2 = arith.constant 0 : index
    %3 = vector.load %arg2[%c0_1, %c0_2] : memref<16x128xf32, #tpu.memory_space<vmem>>, vector<16x128xf32>
    tpu.vector_store %arg2[%c0_1, %c0_2], %2 {strides = array<i32>} : memref<16x128xf32, #tpu.memory_space<vmem>>, vector<16x128xf32>,
    return
  }
  func.func @transform_0(%arg0: i32) -> (i32, i32) {
    %c0_i32 = arith.constant 0 : i32
    %c0_i32_0 = arith.constant 0 : i32
    return %arg0, %c0_i32 : i32, i32
  }
  func.func @transform_1(%arg0: i32) -> (i32, i32) {
    %c0_i32 = arith.constant 0 : i32
    %c0_i32_0 = arith.constant 0 : i32
    return %arg0, %c0_i32 : i32, i32
  }
}

</mosaic_0001>

<bundles_post_ra>
// kernel: tpu_custom_call.1
= control target key start
LH: loop header
LB: loop body
LE: loop exit
PB: predicated region body
PF: predicated region fallthrough
CT: control target
= control target key end

     0   :  { %6 = vsyncpa [#allocation3], 0  ;;  %s114_s0 = inlined_call_operand.hbm [shape: f32[16,128], index: 0, kind: input, shape index: {}]   ;;  %s115_s1 = inlined_call_operand.hbm [shape: f32[16,128], index: 1, kind: output, shape index: {}]  }
   0x1   :  { %7 = vsyncpa [#allocation4], 0  ;;  %s94_s6 = smov [#allocation2]  }
   0x2   :  { %s13_s7 = sshll.u32 %s94_s6, 4  ;;  %s14_s7 = int_to_ptr.vmem [resolvable:$true] %s13_s7 }
   0x3   :  { %s58_s8 = scalar_lea.vmem %s14_s7, 256  ;;  %p63_p1 = scmp.lt.s32.totalorder %s14_s7, %s14_s7 }
   0x4   :  { %p59_p0 = scmp.ne.s32.totalorder %s14_s7, %s58_s8  ;;  %p64_p2 = scmp.lt.s32.totalorder %s58_s8, %s58_s8 }
   0x6   :  { %p65_p3 = por %p64_p2, %p63_p1 }
   0x8   :  { %p66_p4 = pnand %p65_p3, %p59_p0 }
   0xa   :  { %69 = shalt.err (!%p66_p4)
}
   0xb   :  { %s95_s9 = smov 128   ;;  %s96_s10 = smov 8  }
   0xc   :  { %19 = dma.hbm_to_vmem [thread:$0]  %s114_s0, 256, %s14_s7, [#allocation3], %s95_s9, %s95_s9, %s96_s10  }
   0xd   :  { %90 = dma.done.wait [#allocation3], 256  }
   0xe   :  { %91 = vsyncadd [#allocation3], 4294967040  ;;  %s97_s13 = smov [#allocation5]   ;;  %v23_v0 = vld [vmem:[#allocation2] sm:$0xff]  ;;  %v24_v1 = vld [vmem:[#allocation2 + $0x8] sm:$0xff] }
   0xf   :  { %s34_s14 = sshll.u32 %s97_s13, 4  ;;  %v25_v2 = vmax.f32 %v23_v0, 0.0  ;;  %v26_v3 = vmax.f32 %v24_v1, 0.0  ;;  %s35_s14 = int_to_ptr.vmem [resolvable:$true] %s34_s14 }
  0x10   :  { %s70_s15 = scalar_lea.vmem %s35_s14, 256  ;;  %p75_p6 = scmp.lt.s32.totalorder %s35_s14, %s35_s14 }
  0x11   :  { %27 = vst [vmem:[#allocation5] sm:$0xff] %v25_v2  ;;  %28 = vst [vmem:[#allocation5 + $0x8] sm:$0xff] %v26_v3  ;;  %p71_p5 = scmp.ne.s32.totalorder %s35_s14, %s70_s15  ;;  %p76_p7 = scmp.lt.s32.totalorder %s70_s15, %s70_s15 }
  0x13   :  { %p77_p8 = por %p76_p7, %p75_p6 }
  0x15   :  { %p78_p9 = pnand %p77_p8, %p71_p5 }
  0x17   :  { %81 = shalt.err (!%p78_p9)
}
  0x18   :  { %40 = dma.vmem_to_hbm [thread:$0]  %s35_s14, 256, %s115_s1, [#allocation4], %s95_s9, %s95_s9, %s96_s10  }
  0x19   :  { %92 = dma.done.wait [#allocation4], 256  }
  0x1a   :  { %93 = vsyncadd [#allocation4], 4294967040 }
  0x1b   :  { %44 = vsyncpa [#allocation3], 1 }
  0x1c   :  { %45 = vsyncpa [#allocation4], 1 }

</bundles_post_ra>
